<compile_context>
chip_gen: v6e
topology: v6e:2x2x1
jax: 0.10.0
libtpu: 0.0.40
codegen_flags: <defaults>
</compile_context>

<pallas_src>
import jax
import jax.numpy as jnp
from jax.experimental import pallas as pl
from jax.experimental.pallas import tpu as pltpu


# Only bother splitting the DMA into multiple chunks for reasonably large
# arrays; small inputs use a single full-array copy.
_CHUNK_THRESHOLD_BYTES = 4 * 1024 * 1024
_MAX_CHUNKS = 4


def _make_dma_copy_kernel(n_chunks, chunk_rows):
    """Grid-less identity kernel: start n_chunks HBM->HBM DMAs, then wait."""

    def kernel(x_ref, o_ref, sems):
        if n_chunks == 1:
            cp = pltpu.make_async_copy(x_ref, o_ref, sems.at[0])
            cp.start()
            cp.wait()
            return
        copies = []
        for c in range(n_chunks):  # static unroll at trace time
            cp = pltpu.make_async_copy(
                x_ref.at[pl.ds(c * chunk_rows, chunk_rows)],
                o_ref.at[pl.ds(c * chunk_rows, chunk_rows)],
                sems.at[c],
            )
            cp.start()
            copies.append(cp)
        for cp in copies:
            cp.wait()

    return kernel


def _pick_chunks(x):
    """Pick a static chunk count (along dim 0) for the DMA copy."""
    if x.ndim == 0 or x.shape[0] < 2:
        return 1, 0
    nbytes = x.size * jnp.dtype(x.dtype).itemsize
    if nbytes < _CHUNK_THRESHOLD_BYTES:
        return 1, 0
    d0 = x.shape[0]
    for n in (_MAX_CHUNKS, 2):
        if n <= d0 and d0 % n == 0:
            return n, d0 // n
    return 1, 0


def _identity_copy(x):
    """Materialize a fresh copy of x via a grid-less HBM->HBM DMA kernel."""
    n_chunks, chunk_rows = _pick_chunks(x)
    return pl.pallas_call(
        _make_dma_copy_kernel(n_chunks, chunk_rows),
        out_shape=jax.ShapeDtypeStruct(x.shape, x.dtype),
        in_specs=[pl.BlockSpec(memory_space=pl.ANY)],
        out_specs=pl.BlockSpec(memory_space=pl.ANY),
        scratch_shapes=[pltpu.SemaphoreType.DMA((n_chunks,))],
    )(x)


def sasa_block(x, in_channels=None, out_channels=None, *, materialize_copy=False):
    """Pallas implementation of SASABlock.forward (identity).

    By default returns `x` unchanged (fastest possible: zero HBM traffic).
    Set materialize_copy=True to force the data through a real Pallas
    DMA copy kernel (e.g. to obtain a fresh output buffer).
    """
    if x.size == 0:
        return x
    if not materialize_copy:
        return x
    return _identity_copy(x)


if __name__ == "__main__":
    key = jax.random.PRNGKey(0)
    # Small NCHW input consistent with a conv-style block.
    x = jax.random.normal(key, (2, 4, 16, 16), dtype=jnp.float32)

    # Default (production) path: true identity, no data movement.
    y_fast = sasa_block(x, in_channels=4, out_channels=4)
    assert y_fast.shape == x.shape and y_fast.dtype == x.dtype

    # Kernel path: grid-less HBM->HBM DMA copy, verified on TPU.
    y = sasa_block(x, in_channels=4, out_channels=4, materialize_copy=True)
    y = jax.block_until_ready(y)

    assert y.shape == x.shape and y.dtype == x.dtype
    assert bool(jnp.all(y == x))
    assert bool(jnp.all(y_fast == x))
    print("KERNEL_OK")
</pallas_src>

<mosaic_0001>
module attributes {stable_mosaic.version = 11 : i64} {
  func.func @kernel(%arg0: memref<2x4x16x16xf32, #tpu.memory_space<any>>, %arg1: memref<2x4x16x16xf32, #tpu.memory_space<any>>, %arg2: memref<1x!tpu.dma_semaphore, #tpu.memory_space<semaphore_mem>>) attributes {dimension_semantics = [], scalar_prefetch = 0 : i64, scratch_operands = 1 : i64, tpu.core_type = #tpu.core_type<tc>} {
    %c0_i32 = arith.constant 0 : i32
    %0 = tpu.memref_slice %arg2[%c0_i32] : memref<1x!tpu.dma_semaphore, #tpu.memory_space<semaphore_mem>> -> memref<1x!tpu.dma_semaphore, #tpu.memory_space<semaphore_mem>>
    %1 = tpu.memref_squeeze %0 : memref<1x!tpu.dma_semaphore, #tpu.memory_space<semaphore_mem>> -> memref<!tpu.dma_semaphore, #tpu.memory_space<semaphore_mem>>
    tpu.enqueue_dma source(%arg0 : memref<2x4x16x16xf32, #tpu.memory_space<any>>) target(%arg1 : memref<2x4x16x16xf32, #tpu.memory_space<any>>) target_semaphore(%1 : memref<!tpu.dma_semaphore, #tpu.memory_space<semaphore_mem>>)
    %c0_i32_0 = arith.constant 0 : i32
    %2 = tpu.memref_slice %arg2[%c0_i32_0] : memref<1x!tpu.dma_semaphore, #tpu.memory_space<semaphore_mem>> -> memref<1x!tpu.dma_semaphore, #tpu.memory_space<semaphore_mem>>
    %3 = tpu.memref_squeeze %2 : memref<1x!tpu.dma_semaphore, #tpu.memory_space<semaphore_mem>> -> memref<!tpu.dma_semaphore, #tpu.memory_space<semaphore_mem>>
    tpu.wait_dma2 semaphore(%3 : memref<!tpu.dma_semaphore, #tpu.memory_space<semaphore_mem>>) src(%arg0 : memref<2x4x16x16xf32, #tpu.memory_space<any>>) dst(%arg1 : memref<2x4x16x16xf32, #tpu.memory_space<any>>)
    return
  }
}

</mosaic_0001>

<bundles_post_ra>
// kernel: tpu_custom_call.1
= control target key start
LH: loop header
LB: loop body
LE: loop exit
PB: predicated region body
PF: predicated region fallthrough
CT: control target
= control target key end

     0   :  { %s30_s6 = smov [#allocation2]   ;;  %s31_s7 = smov 131072   ;;  %s49_s0 = inlined_call_operand.hbm [shape: f32[2,4,16,16], index: 0, kind: input, shape index: {}]   ;;  %s50_s1 = inlined_call_operand.hbm [shape: f32[2,4,16,16], index: 1, kind: output, shape index: {}]  }
   0x1   :  { %s32_s8 = smov 0  }
   0x2   :  { %12 = dma.general %s49_s0, 2048, %s50_s1, %s30_s6, %s31_s7, [#allocation4], %s32_s8, 0  }
   0x3   :  { %28 = dma.done.wait [#allocation2], 2048 }
   0x4   :  { %29 = vsyncadd [#allocation2], 4294965248 }
   0x5   :  { %18 = vsyncmov [#allocation2] }
   0x8   :  { %s19_s13 = vpop.sfrf %18 }
   0x9   :  { %p24_p0 = scmp.ne.s32.totalorder %s19_s13, 0 }
   0xb   :  { %23 = shalt.err (%p24_p0)  }

</bundles_post_ra>
